<compile_context>
chip_gen: v7x
topology: tpu7x:2x2x1
jax: 0.10.0
libtpu: 0.0.40
codegen_flags: <defaults>
</compile_context>

<pallas_src>
import jax
import jax.numpy as jnp
from jax import lax
from jax.experimental import pallas as pl
from jax.experimental.pallas import tpu as pltpu


def _lookup_concat_kernel(idx_ref, vocab_ref, num_ref, out_ref):
    # idx_ref:   [tile_n, 1]   int32 -- vocab position per row, -1 for OOV
    # vocab_ref: [1, V]        int32 -- vocab values (resident across the grid)
    # num_ref:   [tile_n, K]   int32 -- tile of the numeric tensor 'b'
    # out_ref:   [tile_n, 1+K] int32
    tile_n = idx_ref.shape[0]
    v = vocab_ref.shape[1]

    # Gather via one-hot select + lane reduction (VPU compare/select + XLU reduce,
    # no per-element dynamic addressing). OOV index (-1) matches nothing -> 0,
    # reproducing `vocab.get(val, 0)`. Fine for small V (<= 128 lanes); a large
    # vocab should instead become a reduction grid axis or an SMEM lookup.
    iota = lax.broadcasted_iota(jnp.int32, (tile_n, v), 1)        # [tile_n, V]
    onehot = iota == idx_ref[...]                                  # [tile_n, V]
    selected = jnp.where(onehot, vocab_ref[...], 0)                # [tile_n, V]
    col0 = jnp.sum(selected, axis=1, keepdims=True)                # [tile_n, 1]

    # torch.cat([preprocess(a), b], dim=-1): build the whole tile in vregs and
    # issue ONE full-width store (no 1-lane masked store + misaligned wide store).
    # TODO(synk): output lane width is 1+K (<128) so the store is still a masked
    # vst; padding the output to 128 lanes would change the module's output shape.
    out_ref[...] = jnp.concatenate([col0, num_ref[...]], axis=-1)


def _round_up(x, m):
    return (x + m - 1) // m * m


def model_forward(str_positions, vocab_values, num_col, *, tile_n=512):
    """JAX/Pallas equivalent of Model.forward.

    str_positions: int32 [N]    -- index of each input string in the vocab key
                                   list, -1 if the string is not in the vocab.
    vocab_values:  int32 [V]    -- the vocab dict's values.
    num_col:       int32 [N, K] -- the 'b' tensor.
    Returns {'c': int32 [N, 1+K]}.
    """
    n = int(str_positions.shape[0])
    v = int(vocab_values.shape[0])
    k = int(num_col.shape[1])

    # Tile size: multiple of 8 sublanes, capped (512 rows keeps the per-step
    # double-buffered footprint small enough even for v7x's 64 MiB VMEM while
    # amortizing per-grid-step overhead on v5e/v6e).
    tn = min(int(tile_n), _round_up(n, 8))
    tn = _round_up(tn, 8)
    n_pad = _round_up(n, tn)
    grid_n = n_pad // tn

    idx = str_positions.reshape(n, 1).astype(jnp.int32)
    vocab = vocab_values.reshape(1, v).astype(jnp.int32)
    num = num_col.astype(jnp.int32)

    if n_pad != n:
        # Padded rows use idx = -1 (OOV -> 0) and zero numerics; sliced off below.
        idx = jnp.pad(idx, ((0, n_pad - n), (0, 0)), constant_values=-1)
        num = jnp.pad(num, ((0, n_pad - n), (0, 0)))

    out = pl.pallas_call(
        _lookup_concat_kernel,
        out_shape=jax.ShapeDtypeStruct((n_pad, 1 + k), jnp.int32),
        grid=(grid_n,),
        in_specs=[
            pl.BlockSpec((tn, 1), lambda i: (i, 0)),      # idx: tiled over N
            pl.BlockSpec((1, v), lambda i: (0, 0)),       # vocab: resident
            pl.BlockSpec((tn, k), lambda i: (i, 0)),      # num:  tiled over N
        ],
        out_specs=pl.BlockSpec((tn, 1 + k), lambda i: (i, 0)),
        compiler_params=pltpu.CompilerParams(
            dimension_semantics=("parallel",),            # split grid across TCs (v7x)
        ),
    )(idx, vocab, num)

    return {"c": out[:n]}


if __name__ == "__main__":
    # Deterministic "parameters": the vocab dict from Model.__init__.
    vocab = {"apple": 3, "banana": 7, "cherry": 1, "date": 9}
    vocab_keys = list(vocab.keys())
    vocab_values = jnp.array(list(vocab.values()), dtype=jnp.int32)

    # ---- Small example matching the module (dict with string list 'a', tensor 'b').
    str_col = ["banana", "unknown", "date", "apple", "cherry", "banana", "zzz", "date"]
    # TODO(synk): raw string hashing / dict lookup has no Pallas equivalent;
    # strings are mapped to integer vocab positions in Python, the value lookup
    # + concat run in the kernel.
    positions = jnp.array(
        [vocab_keys.index(s) if s in vocab else -1 for s in str_col],
        dtype=jnp.int32,
    )

    key = jax.random.PRNGKey(0)
    k_num, k_pos2, k_num2 = jax.random.split(key, 3)
    num_col = jax.random.randint(k_num, (len(str_col), 3), 0, 100, dtype=jnp.int32)

    result = model_forward(positions, vocab_values, num_col)
    c = jax.block_until_ready(result["c"])

    expected_col0 = jnp.array(
        [vocab.get(s, 0) for s in str_col], dtype=jnp.int32
    ).reshape(-1, 1)
    expected = jnp.concatenate([expected_col0, num_col], axis=-1)
    assert c.shape == (len(str_col), 1 + num_col.shape[1])
    assert bool(jnp.all(c == expected))

    # ---- Larger check: exercises multi-tile grid + remainder (tail) handling.
    n_big, k_big = 1000, 3
    v_sz = int(vocab_values.shape[0])
    pos_big = jax.random.randint(k_pos2, (n_big,), -1, v_sz, dtype=jnp.int32)
    num_big = jax.random.randint(k_num2, (n_big, k_big), 0, 100, dtype=jnp.int32)

    c_big = jax.block_until_ready(
        model_forward(pos_big, vocab_values, num_big, tile_n=512)["c"]
    )
    ref_col0 = jnp.where(
        pos_big >= 0, vocab_values[jnp.clip(pos_big, 0, v_sz - 1)], 0
    ).reshape(-1, 1).astype(jnp.int32)
    ref_big = jnp.concatenate([ref_col0, num_big], axis=-1)
    assert c_big.shape == (n_big, 1 + k_big)
    assert bool(jnp.all(c_big == ref_big))

    print("KERNEL_OK")
</pallas_src>

<mosaic_0001>
module attributes {stable_mosaic.version = 11 : i64} {
  func.func @_lookup_concat_kernel(%arg0: i32, %arg1: memref<8x1xi32, #tpu.memory_space<vmem>>, %arg2: memref<1x4xi32, #tpu.memory_space<vmem>>, %arg3: memref<8x3xi32, #tpu.memory_space<vmem>>, %arg4: memref<8x4xi32, #tpu.memory_space<vmem>>) attributes {dimension_semantics = [#tpu.dimension_semantics<parallel>], iteration_bounds = array<i64: 1>, scalar_prefetch = 0 : i64, scratch_operands = 0 : i64, tpu.core_type = #tpu.core_type<tc>, window_params = [{transform_indices = @transform_0, window_bounds = array<i64: 8, 1>}, {pipeline_mode = #tpu.pipeline_mode<synchronous>, transform_indices = @transform_1, window_bounds = array<i64: 1, 4>}, {transform_indices = @transform_2, window_bounds = array<i64: 8, 3>}, {transform_indices = @transform_3, window_bounds = array<i64: 8, 4>}]} {
    %0 = tpu.iota {dimensions = array<i32: 1>} : vector<8x4xi32>
    %c0 = arith.constant 0 : index
    %c0_0 = arith.constant 0 : index
    %1 = vector.load %arg1[%c0, %c0_0] : memref<8x1xi32, #tpu.memory_space<vmem>>, vector<8x1xi32>
    %2 = vector.broadcast %1 : vector<8x1xi32> to vector<8x4xi32>
    %3 = arith.cmpi eq, %0, %2 : vector<8x4xi32>
    %c0_1 = arith.constant 0 : index
    %c0_2 = arith.constant 0 : index
    %4 = vector.load %arg2[%c0_1, %c0_2] : memref<1x4xi32, #tpu.memory_space<vmem>>, vector<1x4xi32>
    %c0_i32 = arith.constant 0 : i32
    %5 = vector.shape_cast %4 : vector<1x4xi32> to vector<1x4xi32>
    %6 = vector.broadcast %5 : vector<1x4xi32> to vector<8x4xi32>
    %7 = vector.broadcast %c0_i32 : i32 to vector<8x4xi32>
    %8 = arith.select %3, %6, %7 : vector<8x4xi1>, vector<8x4xi32>
    %cst = arith.constant dense<0> : vector<8xi32>
    %9 = vector.multi_reduction <add>, %8, %cst [1] : vector<8x4xi32> to vector<8xi32>
    %10 = vector.shape_cast %9 : vector<8xi32> to vector<8x1xi32>
    %c0_3 = arith.constant 0 : index
    %c0_4 = arith.constant 0 : index
    %11 = vector.load %arg3[%c0_3, %c0_4] : memref<8x3xi32, #tpu.memory_space<vmem>>, vector<8x3xi32>
    %12 = tpu.concatenate %10, %11 in 1 : vector<8x1xi32>, vector<8x3xi32> -> vector<8x4xi32>
    %c0_5 = arith.constant 0 : index
    %c0_6 = arith.constant 0 : index
    %13 = vector.load %arg4[%c0_5, %c0_6] : memref<8x4xi32, #tpu.memory_space<vmem>>, vector<8x4xi32>
    tpu.vector_store %arg4[%c0_5, %c0_6], %12 {strides = array<i32>} : memref<8x4xi32, #tpu.memory_space<vmem>>, vector<8x4xi32>,
    return
  }
  func.func @transform_0(%arg0: i32) -> (i32, i32) {
    %c0_i32 = arith.constant 0 : i32
    %c0_i32_0 = arith.constant 0 : i32
    return %arg0, %c0_i32 : i32, i32
  }
  func.func @transform_1(%arg0: i32) -> (i32, i32) {
    %c0_i32 = arith.constant 0 : i32
    %c0_i32_0 = arith.constant 0 : i32
    %c0_i32_1 = arith.constant 0 : i32
    return %c0_i32, %c0_i32_0 : i32, i32
  }
  func.func @transform_2(%arg0: i32) -> (i32, i32) {
    %c0_i32 = arith.constant 0 : i32
    %c0_i32_0 = arith.constant 0 : i32
    return %arg0, %c0_i32 : i32, i32
  }
  func.func @transform_3(%arg0: i32) -> (i32, i32) {
    %c0_i32 = arith.constant 0 : i32
    %c0_i32_0 = arith.constant 0 : i32
    return %arg0, %c0_i32 : i32, i32
  }
}

</mosaic_0001>

<bundles_post_ra>
// kernel: tpu_custom_call.1
= control target key start
LH: loop header
LB: loop body
LE: loop exit
PB: predicated region body
PF: predicated region fallthrough
CT: control target
= control target key end

     0   :  { %v55_v0 = vmov 0   ;;  %v14_v2 = vlaneseq  ;;  %vm27_vm0 = vcmask 31744   ;;  %s56_s17 = smov 1   ;;  %vm44_vm2 = vcmask 7168   ;;  %s91_s0 = inlined_call_operand.vmem [shape: s32[8,1], index: 0, kind: input, shape index: {}]   ;;  %s92_s1 = inlined_call_operand.vmem [shape: s32[1,4], index: 1, kind: input, shape index: {}]   ;;  %s93_s2 = inlined_call_operand.vmem [shape: s32[8,3], index: 2, kind: input, shape index: {}]   ;;  %s94_s3 = inlined_call_operand.vmem [shape: s32[8,4], index: 3, kind: output, shape index: {}]  }
   0x1   :  { %54 = vset.pattern.permute.xlu0 %v55_v0  ;;  %v16_v1 = vld [vmem:[%s91_s0] sm:$0xff] }
   0x2   :  { %18 = vperm.xlu0 %54, %v16_v1   ;;  %v15_v3 = vand.u32 127, %v14_v2  ;;  %v51_v4 = vld [vmem:[%s92_s1] ss:$0 sm:$0xff] }
   0x3   :  { %v41_v12 = vld [vmem:[%s93_s2] sm:$0xff] }
  0x81   :  { %v19_v5 = vpop.permute.xlu0 %18 }
  0x82   :  { %vm20_vm1 = vcmp.eq.s32.totalorder %v15_v3, %v19_v5 }
  0x83   :  { %v26_v6 = vsel %vm20_vm1, %v51_v4, 0 }
  0x84   :  { %v28_v7 = vsel %vm27_vm0, %v26_v6, 0 }
  0x85   :  { %v30_v8 = vshrl.u32 %v28_v7, 16  ;;  %v29_v9 = vand.u32 65535, %v28_v7 }
  0x87   :  { %v32_v10 = vcvt.s32.f32 %v30_v8  ;;  %v31_v11 = vcvt.s32.f32 %v29_v9 }
  0x89   :  { %35 = vadd.xlane.f32.xlu0 %v32_v10  ;;  %33 = vadd.xlane.f32.xlu1 %v31_v11 }
  0x9a   :  { %42 = vrot.lane.b32.xlu1 %v41_v12, %s56_s17 }
 0x116   :  { %v36_v13 = vpop.xlane.xlu0 %35  ;;  %v34_v14 = vpop.xlane.xlu1 %33 }
 0x117   :  { %v38_v15 = vcvt.f32.s32 %v36_v13  ;;  %v37_v17 = vcvt.f32.s32 %v34_v14 }
 0x119   :  { %v39_v16 = vshll.u32 %v38_v15, 16 }
 0x11a   :  { %v43_v18 = vpop.permute.xlu1 %42 }
 0x11b   :  { %v40_v19 = vadd.s32 %v39_v16, %v37_v17 }
 0x11d   :  { %v45_v20 = vsel %vm44_vm2, %v40_v19, %v43_v18 }
 0x11e   :  { %46 = vst.msk [vmem:[%s94_s3] sm:$0xff] %vm27_vm0, %v45_v20 }

</bundles_post_ra>
